<compile_context>
chip_gen: v5e
topology: v5e:2x2
jax: 0.10.0
libtpu: 0.0.40
codegen_flags: <defaults>
</compile_context>

<pallas_src>
import jax
import jax.numpy as jnp
import numpy as np
from jax import lax
from jax.experimental import pallas as pl
from jax.experimental.pallas import tpu as pltpu

REG = 1.0  # default regularization parameter `reg` of DomainAwareCriterion


def _make_kernel(reg, d, c, tile_n, num_tiles, use_bf16):
    coral_scale = float(reg) / (4.0 * float(d) * float(d))

    def kernel(counts_ref, y_pred_ref, y_true_ref, feat_ref, dom_ref, out_ref,
               sums_acc, gram_acc, ce_acc):
        i = pl.program_id(0)

        # ---- init accumulators (first tile) ----
        @pl.when(i == 0)
        def _():
            sums_acc[...] = jnp.zeros_like(sums_acc)
            gram_acc[...] = jnp.zeros_like(gram_acc)
            ce_acc[...] = jnp.zeros_like(ce_acc)

        feats = feat_ref[...]                      # (TN, D) f32
        logits = y_pred_ref[...]                   # (TN, C) f32
        labels = y_true_ref[...]                   # (TN, 1) i32
        dom = dom_ref[...]                         # (TN, 1) f32

        # Global counts from SMEM: splat to (1,1) vectors, keep the math on the VPU.
        ns = jnp.full((1, 1), counts_ref[0], dtype=jnp.int32).astype(jnp.float32)
        nt = jnp.full((1, 1), counts_ref[1], dtype=jnp.int32).astype(jnp.float32)
        ns1 = jnp.maximum(ns - 1.0, 1.0)           # guarded; precondition n_s,n_t >= 2
        nt1 = jnp.maximum(nt - 1.0, 1.0)

        # Masks: padded rows (global index >= N) belong to neither domain.
        row = i * tile_n + lax.broadcasted_iota(jnp.int32, (tile_n, 1), 0)
        valid = (row < counts_ref[2]).astype(jnp.float32)
        src = jnp.where(dom >= 0.0, valid, 0.0)    # extract_source_indices: domain >= 0
        tgt = valid - src

        # ---- criterion: cross-entropy on source rows (masked sum; mean at finalize) ----
        row_max = jnp.max(logits, axis=-1, keepdims=True)
        lse = row_max + jnp.log(jnp.sum(jnp.exp(logits - row_max), axis=-1, keepdims=True))
        cls = lax.broadcasted_iota(jnp.int32, (tile_n, c), 1)
        logit_at_label = jnp.sum(jnp.where(cls == labels, logits, 0.0),
                                 axis=-1, keepdims=True)
        ce_rows = lse - logit_at_label             # (TN, 1)
        ce_acc[...] += jnp.sum(ce_rows * src, axis=0, keepdims=True)

        # ---- per-domain feature sums: (TN,8) mask panel @ (TN,D) rides the MXU ----
        col8 = lax.broadcasted_iota(jnp.int32, (tile_n, 8), 1)
        masks8 = jnp.where(col8 == 0, src, jnp.where(col8 == 1, tgt, 0.0))
        sums_acc[...] += lax.dot_general(masks8, feats, (((0,), (0,)), ((), ())),
                                         preferred_element_type=jnp.float32)

        # ---- adapt_criterion: single fused weighted Gram accumulation ----
        w = src * (1.0 / ns1) - tgt * (1.0 / nt1)  # (TN, 1)
        xw = feats * w
        if use_bf16:  # MXU-bound regime on v6e/v7x; f32 accumulation preserved.
            a, b = xw.astype(jnp.bfloat16), feats.astype(jnp.bfloat16)
        else:
            a, b = xw, feats
        gram_acc[...] += lax.dot_general(a, b, (((0,), (0,)), ((), ())),
                                         preferred_element_type=jnp.float32)

        # ---- finalize (last tile): mean correction + Frobenius norm + CE mean ----
        @pl.when(i == num_tiles - 1)
        def _():
            row8 = lax.broadcasted_iota(jnp.int32, (8, 1), 0)
            n_col = jnp.where(row8 == 0, ns, jnp.where(row8 == 1, nt, 1.0))   # (8,1)
            mu = sums_acc[...] * (1.0 / jnp.maximum(n_col, 1.0))              # (8,D)
            coef = (jnp.where(row8 == 0, -n_col, jnp.where(row8 == 1, n_col, 0.0))
                    / jnp.maximum(n_col - 1.0, 1.0))                          # (8,1)
            corr = lax.dot_general(mu * coef, mu, (((0,), (0,)), ((), ())),
                                   preferred_element_type=jnp.float32)        # (D,D)
            diff = gram_acc[...] + corr            # = cov_s - cov_t
            sq = diff * diff
            coral = jnp.sum(jnp.sum(sq, axis=1, keepdims=True), axis=0, keepdims=True)
            ce_mean = ce_acc[...] * (1.0 / jnp.maximum(ns, 1.0))
            out_ref[...] = ce_mean + coral_scale * coral

    return kernel


def domain_aware_criterion(y_pred, y_true, features, sample_domain, *,
                           reg=REG, tile_n=None, mxu_bf16=None):
    """CE(source) + reg * DeepCORAL(features), tiled over the batch dimension."""
    n, c = y_pred.shape
    d = features.shape[1]
    y_true = y_true.reshape(-1)
    sample_domain = sample_domain.reshape(-1)

    if tile_n is None:
        tile_n = 256 if n > 256 else -(-n // 8) * 8
    tile_n = max(8, (int(tile_n) // 8) * 8)
    n_pad = -(-n // tile_n) * tile_n
    num_tiles = n_pad // tile_n
    pad = n_pad - n

    # bf16 MXU inputs only where the Gram matmul dominates; re-validated numerics.
    use_bf16 = (d >= 256) if mxu_bf16 is None else bool(mxu_bf16)

    yp = jnp.pad(y_pred.astype(jnp.float32), ((0, pad), (0, 0)))
    yt = jnp.pad(y_true.reshape(n, 1).astype(jnp.int32), ((0, pad), (0, 0)))
    ft = jnp.pad(features.astype(jnp.float32), ((0, pad), (0, 0)))
    dm = jnp.pad(sample_domain.reshape(n, 1).astype(jnp.float32), ((0, pad), (0, 0)))

    n_src = jnp.sum((sample_domain >= 0).astype(jnp.int32)).astype(jnp.int32)
    counts = jnp.stack([n_src, jnp.int32(n) - n_src, jnp.int32(n)])  # [n_s, n_t, N]

    # VMEM budget: double-buffered input tiles ((TN,1) refs pad lanes to 128) +
    # resident (D,D)/(8,D)/(1,1) accumulators, with headroom; capped for v7x (64 MiB).
    bytes_in = 2 * (tile_n * d * 4 + tile_n * c * 4 + 2 * tile_n * 128 * 4)
    bytes_scr = d * d * 4 + 8 * max(d, 128) * 4 + 8 * 128 * 4
    vmem_limit = int(min(max(2 * (bytes_in + bytes_scr), 16 << 20), 64 << 20))

    kernel = _make_kernel(reg, d, c, tile_n, num_tiles, use_bf16)

    grid_spec = pltpu.PrefetchScalarGridSpec(
        num_scalar_prefetch=1,
        grid=(num_tiles,),
        in_specs=[
            pl.BlockSpec((tile_n, c), lambda i, s: (i, 0)),   # y_pred tile
            pl.BlockSpec((tile_n, 1), lambda i, s: (i, 0)),   # y_true tile
            pl.BlockSpec((tile_n, d), lambda i, s: (i, 0)),   # features tile
            pl.BlockSpec((tile_n, 1), lambda i, s: (i, 0)),   # sample_domain tile
        ],
        out_specs=pl.BlockSpec((1, 1), lambda i, s: (0, 0)),  # resident scalar output
        scratch_shapes=[
            pltpu.VMEM((8, d), jnp.float32),   # per-domain feature sums (rows 0/1)
            pltpu.VMEM((d, d), jnp.float32),   # fused weighted Gram accumulator
            pltpu.VMEM((1, 1), jnp.float32),   # masked CE sum
        ],
    )

    out = pl.pallas_call(
        kernel,
        out_shape=jax.ShapeDtypeStruct((1, 1), jnp.float32),
        grid_spec=grid_spec,
        compiler_params=pltpu.CompilerParams(
            dimension_semantics=("arbitrary",),
            vmem_limit_bytes=vmem_limit,
        ),
    )(counts, yp, yt, ft, dm)
    return out[0, 0]


def _reference(y_pred, y_true, features, sample_domain, reg=REG):
    """Pure numpy reference mimicking the PyTorch module with dynamic indexing."""
    y_pred = np.asarray(y_pred, np.float64)
    y_true = np.asarray(y_true)
    features = np.asarray(features, np.float64)
    sample_domain = np.asarray(sample_domain)
    src = sample_domain >= 0
    yps, yts = y_pred[src], y_true[src]
    shifted = yps - yps.max(axis=-1, keepdims=True)
    logp = shifted - np.log(np.exp(shifted).sum(axis=-1, keepdims=True))
    ce = -np.mean(logp[np.arange(yps.shape[0]), yts])
    fs, ft = features[src], features[~src]
    cov_s = np.cov(fs, rowvar=False)
    cov_t = np.cov(ft, rowvar=False)
    d = features.shape[1]
    coral = np.sum((cov_s - cov_t) ** 2) / (4.0 * d * d)
    return ce + reg * coral


if __name__ == "__main__":
    key = jax.random.PRNGKey(0)
    N, C, D = 12, 4, 32
    k1, k2, k3 = jax.random.split(key, 3)

    y_pred = jax.random.normal(k1, (N, C), jnp.float32)            # logits
    features = jax.random.normal(k2, (N, D), jnp.float32)          # layer features
    y_true = jax.random.randint(k3, (N,), 0, C, jnp.int32)         # labels
    # 7 source samples (positive domain id), 5 target samples (negative)
    sample_domain = jnp.array([1, 1, 1, 1, 1, 1, 1, -2, -2, -2, -2, -2], jnp.float32)

    # tile_n=8 -> 2 tiles (second tile half-padded): exercises the tiled accumulator
    # path, the valid-row masking, and the pl.when init/finalize phases.
    loss = domain_aware_criterion(y_pred, y_true, features, sample_domain, tile_n=8)
    loss = jax.block_until_ready(loss)

    ref = _reference(y_pred, y_true, features, sample_domain)
    assert np.allclose(np.asarray(loss, np.float64), ref, rtol=1e-4, atol=1e-5), (
        float(loss),
        float(ref),
    )
    print("KERNEL_OK")
</pallas_src>

<mosaic_0001>
module attributes {stable_mosaic.version = 11 : i64} {
  func.func @kernel(%arg0: i32, %arg1: memref<3xi32, #tpu.memory_space<smem>>, %arg2: memref<8x4xf32, #tpu.memory_space<vmem>>, %arg3: memref<8x1xi32, #tpu.memory_space<vmem>>, %arg4: memref<8x32xf32, #tpu.memory_space<vmem>>, %arg5: memref<8x1xf32, #tpu.memory_space<vmem>>, %arg6: memref<1x1xf32, #tpu.memory_space<vmem>>, %arg7: memref<8x32xf32, #tpu.memory_space<vmem>>, %arg8: memref<32x32xf32, #tpu.memory_space<vmem>>, %arg9: memref<1x1xf32, #tpu.memory_space<vmem>>) attributes {dimension_semantics = [#tpu.dimension_semantics<arbitrary>], iteration_bounds = array<i64: 2>, scalar_prefetch = 1 : i64, scratch_operands = 3 : i64, tpu.core_type = #tpu.core_type<tc>, window_params = [{transform_indices = @transform_0, window_bounds = array<i64: 8, 4>}, {transform_indices = @transform_1, window_bounds = array<i64: 8, 1>}, {transform_indices = @transform_2, window_bounds = array<i64: 8, 32>}, {transform_indices = @transform_3, window_bounds = array<i64: 8, 1>}, {pipeline_mode = #tpu.pipeline_mode<synchronous>, transform_indices = @transform_4, window_bounds = array<i64: 1, 1>}]} {
    %c0_i32 = arith.constant 0 : i32
    %0 = arith.cmpi eq, %arg0, %c0_i32 : i32
    %1 = arith.extui %0 : i1 to i32
    %c0_i32_0 = arith.constant 0 : i32
    %2 = arith.cmpi ne, %1, %c0_i32_0 : i32
    scf.if %2 {
      %cst_39 = arith.constant 0.000000e+00 : f32
      %92 = vector.broadcast %cst_39 : f32 to vector<8x32xf32>
      %c0_40 = arith.constant 0 : index
      %c0_41 = arith.constant 0 : index
      %93 = vector.load %arg7[%c0_40, %c0_41] : memref<8x32xf32, #tpu.memory_space<vmem>>, vector<8x32xf32>
      tpu.vector_store %arg7[%c0_40, %c0_41], %92 {strides = array<i32>} : memref<8x32xf32, #tpu.memory_space<vmem>>, vector<8x32xf32>,
      %cst_42 = arith.constant 0.000000e+00 : f32
      %94 = vector.broadcast %cst_42 : f32 to vector<32x32xf32>
      %c0_43 = arith.constant 0 : index
      %c0_44 = arith.constant 0 : index
      %95 = vector.load %arg8[%c0_43, %c0_44] : memref<32x32xf32, #tpu.memory_space<vmem>>, vector<32x32xf32>
      tpu.vector_store %arg8[%c0_43, %c0_44], %94 {strides = array<i32>} : memref<32x32xf32, #tpu.memory_space<vmem>>, vector<32x32xf32>,
      %cst_45 = arith.constant 0.000000e+00 : f32
      %96 = vector.broadcast %cst_45 : f32 to vector<1x1xf32>
      %c0_46 = arith.constant 0 : index
      %c0_47 = arith.constant 0 : index
      %97 = vector.load %arg9[%c0_46, %c0_47] : memref<1x1xf32, #tpu.memory_space<vmem>>, vector<1x1xf32>
      tpu.vector_store %arg9[%c0_46, %c0_47], %96 {strides = array<i32>} : memref<1x1xf32, #tpu.memory_space<vmem>>, vector<1x1xf32>,
    } else {
    }
    %c0 = arith.constant 0 : index
    %c0_1 = arith.constant 0 : index
    %3 = vector.load %arg4[%c0, %c0_1] : memref<8x32xf32, #tpu.memory_space<vmem>>, vector<8x32xf32>
    %c0_2 = arith.constant 0 : index
    %c0_3 = arith.constant 0 : index
    %4 = vector.load %arg2[%c0_2, %c0_3] : memref<8x4xf32, #tpu.memory_space<vmem>>, vector<8x4xf32>
    %c0_4 = arith.constant 0 : index
    %c0_5 = arith.constant 0 : index
    %5 = vector.load %arg3[%c0_4, %c0_5] : memref<8x1xi32, #tpu.memory_space<vmem>>, vector<8x1xi32>
    %c0_6 = arith.constant 0 : index
    %c0_7 = arith.constant 0 : index
    %6 = vector.load %arg5[%c0_6, %c0_7] : memref<8x1xf32, #tpu.memory_space<vmem>>, vector<8x1xf32>
    %c0_8 = arith.constant 0 : index
    %7 = memref.load %arg1[%c0_8] : memref<3xi32, #tpu.memory_space<smem>>
    %8 = vector.broadcast %7 : i32 to vector<1x1xi32>
    %9 = arith.sitofp %8 : vector<1x1xi32> to vector<1x1xf32>
    %c1 = arith.constant 1 : index
    %10 = memref.load %arg1[%c1] : memref<3xi32, #tpu.memory_space<smem>>
    %11 = vector.broadcast %10 : i32 to vector<1x1xi32>
    %12 = arith.sitofp %11 : vector<1x1xi32> to vector<1x1xf32>
    %cst = arith.constant 1.000000e+00 : f32
    %13 = vector.broadcast %cst : f32 to vector<1x1xf32>
    %14 = arith.subf %9, %13 : vector<1x1xf32>
    %cst_9 = arith.constant 1.000000e+00 : f32
    %15 = vector.broadcast %cst_9 : f32 to vector<1x1xf32>
    %16 = arith.maximumf %14, %15 : vector<1x1xf32>
    %cst_10 = arith.constant 1.000000e+00 : f32
    %17 = vector.broadcast %cst_10 : f32 to vector<1x1xf32>
    %18 = arith.subf %12, %17 : vector<1x1xf32>
    %cst_11 = arith.constant 1.000000e+00 : f32
    %19 = vector.broadcast %cst_11 : f32 to vector<1x1xf32>
    %20 = arith.maximumf %18, %19 : vector<1x1xf32>
    %c8_i32 = arith.constant 8 : i32
    %21 = arith.muli %arg0, %c8_i32 : i32
    %22 = tpu.iota {dimensions = array<i32: 0>} : vector<8x1xi32>
    %23 = vector.broadcast %21 : i32 to vector<8x1xi32>
    %24 = arith.addi %23, %22 : vector<8x1xi32>
    %c2 = arith.constant 2 : index
    %25 = memref.load %arg1[%c2] : memref<3xi32, #tpu.memory_space<smem>>
    %26 = vector.broadcast %25 : i32 to vector<8x1xi32>
    %27 = arith.cmpi slt, %24, %26 : vector<8x1xi32>
    %28 = arith.extui %27 : vector<8x1xi1> to vector<8x1xi32>
    %29 = arith.sitofp %28 : vector<8x1xi32> to vector<8x1xf32>
    %cst_12 = arith.constant 0.000000e+00 : f32
    %30 = vector.broadcast %cst_12 : f32 to vector<8x1xf32>
    %31 = arith.cmpf oge, %6, %30 : vector<8x1xf32>
    %cst_13 = arith.constant 0.000000e+00 : f32
    %32 = vector.broadcast %cst_13 : f32 to vector<8x1xf32>
    %33 = arith.select %31, %29, %32 : vector<8x1xi1>, vector<8x1xf32>
    %34 = arith.subf %29, %33 : vector<8x1xf32>
    %cst_14 = arith.constant dense<0xFF800000> : vector<8xf32>
    %35 = vector.multi_reduction <maximumf>, %4, %cst_14 [1] : vector<8x4xf32> to vector<8xf32>
    %36 = vector.shape_cast %35 : vector<8xf32> to vector<8x1xf32>
    %37 = vector.broadcast %36 : vector<8x1xf32> to vector<8x4xf32>
    %38 = arith.subf %4, %37 : vector<8x4xf32>
    %39 = math.exp %38 : vector<8x4xf32>
    %cst_15 = arith.constant dense<0.000000e+00> : vector<8xf32>
    %40 = vector.multi_reduction <add>, %39, %cst_15 [1] : vector<8x4xf32> to vector<8xf32>
    %41 = vector.shape_cast %40 : vector<8xf32> to vector<8x1xf32>
    %42 = math.log %41 : vector<8x1xf32>
    %43 = arith.addf %36, %42 : vector<8x1xf32>
    %44 = tpu.iota {dimensions = array<i32: 1>} : vector<8x4xi32>
    %45 = vector.broadcast %5 : vector<8x1xi32> to vector<8x4xi32>
    %46 = arith.cmpi eq, %44, %45 : vector<8x4xi32>
    %cst_16 = arith.constant 0.000000e+00 : f32
    %47 = vector.broadcast %cst_16 : f32 to vector<8x4xf32>
    %48 = arith.select %46, %4, %47 : vector<8x4xi1>, vector<8x4xf32>
    %cst_17 = arith.constant dense<0.000000e+00> : vector<8xf32>
    %49 = vector.multi_reduction <add>, %48, %cst_17 [1] : vector<8x4xf32> to vector<8xf32>
    %50 = vector.shape_cast %49 : vector<8xf32> to vector<8x1xf32>
    %51 = arith.subf %43, %50 : vector<8x1xf32>
    %c0_18 = arith.constant 0 : index
    %c0_19 = arith.constant 0 : index
    %52 = vector.load %arg9[%c0_18, %c0_19] : memref<1x1xf32, #tpu.memory_space<vmem>>, vector<1x1xf32>
    %53 = arith.mulf %51, %33 : vector<8x1xf32>
    %cst_20 = arith.constant dense<0.000000e+00> : vector<1xf32>
    %54 = vector.multi_reduction <add>, %53, %cst_20 [0] : vector<8x1xf32> to vector<1xf32>
    %55 = vector.shape_cast %54 : vector<1xf32> to vector<1x1xf32>
    %56 = arith.addf %52, %55 : vector<1x1xf32>
    %c0_21 = arith.constant 0 : index
    %c0_22 = arith.constant 0 : index
    %57 = vector.load %arg9[%c0_21, %c0_22] : memref<1x1xf32, #tpu.memory_space<vmem>>, vector<1x1xf32>
    tpu.vector_store %arg9[%c0_21, %c0_22], %56 {strides = array<i32>} : memref<1x1xf32, #tpu.memory_space<vmem>>, vector<1x1xf32>,
    %58 = tpu.iota {dimensions = array<i32: 1>} : vector<8x8xi32>
    %c0_i32_23 = arith.constant 0 : i32
    %59 = vector.broadcast %c0_i32_23 : i32 to vector<8x8xi32>
    %60 = arith.cmpi eq, %58, %59 : vector<8x8xi32>
    %c1_i32 = arith.constant 1 : i32
    %61 = vector.broadcast %c1_i32 : i32 to vector<8x8xi32>
    %62 = arith.cmpi eq, %58, %61 : vector<8x8xi32>
    %cst_24 = arith.constant 0.000000e+00 : f32
    %63 = vector.shape_cast %34 : vector<8x1xf32> to vector<8x1xf32>
    %64 = vector.broadcast %63 : vector<8x1xf32> to vector<8x8xf32>
    %65 = vector.broadcast %cst_24 : f32 to vector<8x8xf32>
    %66 = arith.select %62, %64, %65 : vector<8x8xi1>, vector<8x8xf32>
    %67 = vector.shape_cast %33 : vector<8x1xf32> to vector<8x1xf32>
    %68 = vector.broadcast %67 : vector<8x1xf32> to vector<8x8xf32>
    %69 = arith.select %60, %68, %66 : vector<8x8xi1>, vector<8x8xf32>
    %c0_25 = arith.constant 0 : index
    %c0_26 = arith.constant 0 : index
    %70 = vector.load %arg7[%c0_25, %c0_26] : memref<8x32xf32, #tpu.memory_space<vmem>>, vector<8x32xf32>
    %cst_27 = arith.constant dense<0.000000e+00> : vector<8x32xf32>
    %71 = tpu.matmul %69, %3, %cst_27 {dimension_numbers = #tpu.dot_dimension_numbers<[0], [0], [1], [1], [0, 1, 1, 1], [], []>} : vector<8x8xf32>, vector<8x32xf32>, vector<8x32xf32> -> vector<8x32xf32>
    %72 = arith.addf %70, %71 : vector<8x32xf32>
    %c0_28 = arith.constant 0 : index
    %c0_29 = arith.constant 0 : index
    %73 = vector.load %arg7[%c0_28, %c0_29] : memref<8x32xf32, #tpu.memory_space<vmem>>, vector<8x32xf32>
    tpu.vector_store %arg7[%c0_28, %c0_29], %72 {strides = array<i32>} : memref<8x32xf32, #tpu.memory_space<vmem>>, vector<8x32xf32>,
    %cst_30 = arith.constant 1.000000e+00 : f32
    %74 = vector.broadcast %cst_30 : f32 to vector<1x1xf32>
    %75 = arith.divf %74, %16 : vector<1x1xf32>
    %76 = vector.broadcast %75 : vector<1x1xf32> to vector<8x1xf32>
    %77 = arith.mulf %33, %76 : vector<8x1xf32>
    %cst_31 = arith.constant 1.000000e+00 : f32
    %78 = vector.broadcast %cst_31 : f32 to vector<1x1xf32>
    %79 = arith.divf %78, %20 : vector<1x1xf32>
    %80 = vector.broadcast %79 : vector<1x1xf32> to vector<8x1xf32>
    %81 = arith.mulf %34, %80 : vector<8x1xf32>
    %82 = arith.subf %77, %81 : vector<8x1xf32>
    %83 = vector.broadcast %82 : vector<8x1xf32> to vector<8x32xf32>
    %84 = arith.mulf %3, %83 : vector<8x32xf32>
    %c0_32 = arith.constant 0 : index
    %c0_33 = arith.constant 0 : index
    %85 = vector.load %arg8[%c0_32, %c0_33] : memref<32x32xf32, #tpu.memory_space<vmem>>, vector<32x32xf32>
    %cst_34 = arith.constant dense<0.000000e+00> : vector<32x32xf32>
    %86 = tpu.matmul %84, %3, %cst_34 {dimension_numbers = #tpu.dot_dimension_numbers<[0], [0], [1], [1], [0, 1, 1, 1], [], []>} : vector<8x32xf32>, vector<8x32xf32>, vector<32x32xf32> -> vector<32x32xf32>
    %87 = arith.addf %85, %86 : vector<32x32xf32>
    %c0_35 = arith.constant 0 : index
    %c0_36 = arith.constant 0 : index
    %88 = vector.load %arg8[%c0_35, %c0_36] : memref<32x32xf32, #tpu.memory_space<vmem>>, vector<32x32xf32>
    tpu.vector_store %arg8[%c0_35, %c0_36], %87 {strides = array<i32>} : memref<32x32xf32, #tpu.memory_space<vmem>>, vector<32x32xf32>,
    %c1_i32_37 = arith.constant 1 : i32
    %89 = arith.cmpi eq, %arg0, %c1_i32_37 : i32
    %90 = arith.extui %89 : i1 to i32
    %c0_i32_38 = arith.constant 0 : i32
    %91 = arith.cmpi ne, %90, %c0_i32_38 : i32
    scf.if %91 {
      %92 = tpu.iota {dimensions = array<i32: 0>} : vector<8x1xi32>
      %c0_i32_39 = arith.constant 0 : i32
      %93 = vector.broadcast %c0_i32_39 : i32 to vector<8x1xi32>
      %94 = arith.cmpi eq, %92, %93 : vector<8x1xi32>
      %c1_i32_40 = arith.constant 1 : i32
      %95 = vector.broadcast %c1_i32_40 : i32 to vector<8x1xi32>
      %96 = arith.cmpi eq, %92, %95 : vector<8x1xi32>
      %cst_41 = arith.constant 1.000000e+00 : f32
      %97 = vector.shape_cast %12 : vector<1x1xf32> to vector<1x1xf32>
      %98 = vector.broadcast %97 : vector<1x1xf32> to vector<8x1xf32>
      %99 = vector.broadcast %cst_41 : f32 to vector<8x1xf32>
      %100 = arith.select %96, %98, %99 : vector<8x1xi1>, vector<8x1xf32>
      %101 = vector.shape_cast %9 : vector<1x1xf32> to vector<1x1xf32>
      %102 = vector.broadcast %101 : vector<1x1xf32> to vector<8x1xf32>
      %103 = arith.select %94, %102, %100 : vector<8x1xi1>, vector<8x1xf32>
      %c0_42 = arith.constant 0 : index
      %c0_43 = arith.constant 0 : index
      %104 = vector.load %arg7[%c0_42, %c0_43] : memref<8x32xf32, #tpu.memory_space<vmem>>, vector<8x32xf32>
      %cst_44 = arith.constant 1.000000e+00 : f32
      %105 = vector.broadcast %cst_44 : f32 to vector<8x1xf32>
      %106 = arith.maximumf %103, %105 : vector<8x1xf32>
      %cst_45 = arith.constant 1.000000e+00 : f32
      %107 = vector.broadcast %cst_45 : f32 to vector<8x1xf32>
      %108 = arith.divf %107, %106 : vector<8x1xf32>
      %109 = vector.broadcast %108 : vector<8x1xf32> to vector<8x32xf32>
      %110 = arith.mulf %104, %109 : vector<8x32xf32>
      %c0_i32_46 = arith.constant 0 : i32
      %111 = vector.broadcast %c0_i32_46 : i32 to vector<8x1xi32>
      %112 = arith.cmpi eq, %92, %111 : vector<8x1xi32>
      %cst_47 = arith.constant 0.000000e+00 : f32
      %113 = vector.broadcast %cst_47 : f32 to vector<8x1xf32>
      %114 = arith.subf %113, %103 : vector<8x1xf32>
      %c1_i32_48 = arith.constant 1 : i32
      %115 = vector.broadcast %c1_i32_48 : i32 to vector<8x1xi32>
      %116 = arith.cmpi eq, %92, %115 : vector<8x1xi32>
      %cst_49 = arith.constant 0.000000e+00 : f32
      %117 = vector.broadcast %cst_49 : f32 to vector<8x1xf32>
      %118 = arith.select %116, %103, %117 : vector<8x1xi1>, vector<8x1xf32>
      %119 = arith.select %112, %114, %118 : vector<8x1xi1>, vector<8x1xf32>
      %cst_50 = arith.constant 1.000000e+00 : f32
      %120 = vector.broadcast %cst_50 : f32 to vector<8x1xf32>
      %121 = arith.subf %103, %120 : vector<8x1xf32>
      %cst_51 = arith.constant 1.000000e+00 : f32
      %122 = vector.broadcast %cst_51 : f32 to vector<8x1xf32>
      %123 = arith.maximumf %121, %122 : vector<8x1xf32>
      %124 = arith.divf %119, %123 : vector<8x1xf32>
      %125 = vector.broadcast %124 : vector<8x1xf32> to vector<8x32xf32>
      %126 = arith.mulf %110, %125 : vector<8x32xf32>
      %cst_52 = arith.constant dense<0.000000e+00> : vector<32x32xf32>
      %127 = tpu.matmul %126, %110, %cst_52 {dimension_numbers = #tpu.dot_dimension_numbers<[0], [0], [1], [1], [0, 1, 1, 1], [], []>} : vector<8x32xf32>, vector<8x32xf32>, vector<32x32xf32> -> vector<32x32xf32>
      %c0_53 = arith.constant 0 : index
      %c0_54 = arith.constant 0 : index
      %128 = vector.load %arg8[%c0_53, %c0_54] : memref<32x32xf32, #tpu.memory_space<vmem>>, vector<32x32xf32>
      %129 = arith.addf %128, %127 : vector<32x32xf32>
      %130 = arith.mulf %129, %129 : vector<32x32xf32>
      %cst_55 = arith.constant dense<0.000000e+00> : vector<32xf32>
      %131 = vector.multi_reduction <add>, %130, %cst_55 [1] : vector<32x32xf32> to vector<32xf32>
      %132 = vector.shape_cast %131 : vector<32xf32> to vector<32x1xf32>
      %cst_56 = arith.constant dense<0.000000e+00> : vector<1xf32>
      %133 = vector.multi_reduction <add>, %132, %cst_56 [0] : vector<32x1xf32> to vector<1xf32>
      %134 = vector.shape_cast %133 : vector<1xf32> to vector<1x1xf32>
      %c0_57 = arith.constant 0 : index
      %c0_58 = arith.constant 0 : index
      %135 = vector.load %arg9[%c0_57, %c0_58] : memref<1x1xf32, #tpu.memory_space<vmem>>, vector<1x1xf32>
      %cst_59 = arith.constant 1.000000e+00 : f32
      %136 = vector.broadcast %cst_59 : f32 to vector<1x1xf32>
      %137 = arith.maximumf %9, %136 : vector<1x1xf32>
      %cst_60 = arith.constant 1.000000e+00 : f32
      %138 = vector.broadcast %cst_60 : f32 to vector<1x1xf32>
      %139 = arith.divf %138, %137 : vector<1x1xf32>
      %140 = arith.mulf %135, %139 : vector<1x1xf32>
      %cst_61 = arith.constant 2.44140625E-4 : f32
      %141 = vector.broadcast %cst_61 : f32 to vector<1x1xf32>
      %142 = arith.mulf %141, %134 : vector<1x1xf32>
      %143 = arith.addf %140, %142 : vector<1x1xf32>
      %c0_62 = arith.constant 0 : index
      %c0_63 = arith.constant 0 : index
      %144 = vector.load %arg6[%c0_62, %c0_63] : memref<1x1xf32, #tpu.memory_space<vmem>>, vector<1x1xf32>
      tpu.vector_store %arg6[%c0_62, %c0_63], %143 {strides = array<i32>} : memref<1x1xf32, #tpu.memory_space<vmem>>, vector<1x1xf32>,
    } else {
    }
    return
  }
  func.func @transform_0(%arg0: i32, %arg1: memref<3xi32, #tpu.memory_space<smem>>) -> (i32, i32) {
    %c0_i32 = arith.constant 0 : i32
    %c0_i32_0 = arith.constant 0 : i32
    return %arg0, %c0_i32 : i32, i32
  }
  func.func @transform_1(%arg0: i32, %arg1: memref<3xi32, #tpu.memory_space<smem>>) -> (i32, i32) {
    %c0_i32 = arith.constant 0 : i32
    %c0_i32_0 = arith.constant 0 : i32
    return %arg0, %c0_i32 : i32, i32
  }
  func.func @transform_2(%arg0: i32, %arg1: memref<3xi32, #tpu.memory_space<smem>>) -> (i32, i32) {
    %c0_i32 = arith.constant 0 : i32
    %c0_i32_0 = arith.constant 0 : i32
    return %arg0, %c0_i32 : i32, i32
  }
  func.func @transform_3(%arg0: i32, %arg1: memref<3xi32, #tpu.memory_space<smem>>) -> (i32, i32) {
    %c0_i32 = arith.constant 0 : i32
    %c0_i32_0 = arith.constant 0 : i32
    return %arg0, %c0_i32 : i32, i32
  }
  func.func @transform_4(%arg0: i32, %arg1: memref<3xi32, #tpu.memory_space<smem>>) -> (i32, i32) {
    %c0_i32 = arith.constant 0 : i32
    %c0_i32_0 = arith.constant 0 : i32
    %c0_i32_1 = arith.constant 0 : i32
    return %c0_i32, %c0_i32_0 : i32, i32
  }
}

</mosaic_0001>

<bundles_post_ra>
// kernel: tpu_custom_call.1
= control target key start
LH: loop header
LB: loop body
LE: loop exit
PB: predicated region body
PF: predicated region fallthrough
CT: control target
= control target key end

     0   :  { %s898_s21 = smov [#allocation6]   ;;  %s1044_s0 = inlined_call_operand.vmem [shape: s32[3], index: 0, kind: input, shape index: {}]   ;;  %s1045_s1 = inlined_call_operand.vmem [shape: f32[16,4], index: 1, kind: input, shape index: {}]   ;;  %s1046_s2 = inlined_call_operand.vmem [shape: s32[16,1], index: 2, kind: input, shape index: {}]   ;;  %s1047_s3 = inlined_call_operand.vmem [shape: f32[16,32], index: 3, kind: input, shape index: {}]   ;;  %s1048_s4 = inlined_call_operand.vmem [shape: f32[16,1], index: 4, kind: input, shape index: {}]   ;;  %s1049_s5 = inlined_call_operand.hbm [shape: f32[1,1], index: 5, kind: output, shape index: {}]  }
   0x1   :  { %s11_s20 = sshll.u32 %s1044_s0, 4  ;;  %s12_s20 = int_to_ptr.vmem [resolvable:$true] %s11_s20 }
   0x2   :  { %14 = dma.vmem_to_smem %s12_s20, 16, %s898_s21, [#allocation5] }
   0x3   :  { %888 = dma.done.wait [#allocation5], 16 }
   0x4   :  { %889 = vsyncadd [#allocation5], 4294967280 }
   0x5   :  { %17 = sfence }
   0x6   :  { %18 = vsyncpa [#allocation8], 0  ;;  %s936_s22 = smov 0  }
   0x7 LB: > { %s942_s23 = sadd.s32 4294967295, %s896_s22   ;;  %p776_p0 = scmp.ge.s32.totalorder %s896_s22, 1  ;;  %s896_s22 = sphi %s936_s22, %s24_s22  }
   0x8   : > { %p193_p1 = scmp.lt.s32.totalorder %s896_s22, 3 }
   0xa   : > { %p194_p2 = pnand %p776_p0, %p193_p1 }
   0xb   : > { %p225_p3 = scmp.lt.s32.totalorder (!%p194_p2), %s942_s23, 1  ;;  %p781_p4 = scmp.ne.s32.totalorder (!%p194_p2), %s942_s23, 0 }
   0xc   : > { %197 = sbr.rel (%p194_p2) target bundleno = 1072 (0x430), region = 36 }
  0x11   : > { %s226_s0 = scalar_select %p225_p3, %s942_s23, 1 }
  0x12   : > { %244 = sbr.rel (%p781_p4) target bundleno = 30 (0x1e), region = 40 }
  0x13   : > { %s948_s24 = sshll.u32 %s226_s0, 3 }
  0x14   : > { %s228_s27 = scalar_lea.vmem %s1045_s1, %s948_s24  ;;  %s232_s30 = scalar_lea.vmem %s1046_s2, %s948_s24 }
  0x15   : > { %s236_s8 = scalar_lea.vmem %s1047_s3, %s948_s24  ;;  %s240_s11 = scalar_lea.vmem %s1048_s4, %s948_s24 }
  0x17   : > { %vm245_vm0 = vcmask 261120   ;;  %v899_v0 = vmov 0.0   ;;  %vm251_vm1 = vcmask 0  }
  0x18   : > { %246 = vst.msk [vmem:[#allocation2] sm:$0xff] %vm245_vm0, %v899_v0 }
  0x19   : > { %247 = vst.msk [vmem:[#allocation3] sm:$0xff] %vm245_vm0, %v899_v0 }
  0x1a   : > { %248 = vst.msk [vmem:[#allocation3 + $0x8] sm:$0xff] %vm245_vm0, %v899_v0 }
  0x1b   : > { %249 = vst.msk [vmem:[#allocation3 + $0x10] sm:$0xff] %vm245_vm0, %v899_v0 }
  0x1c   : > { %250 = vst.msk [vmem:[#allocation3 + $0x18] sm:$0xff] %vm245_vm0, %v899_v0 }
  0x1d   : > { %252 = vst.msk [vmem:[#allocation4] sm:$0x1] %vm251_vm1, %v899_v0 }
  0x1e PF: > { %s257_s12 = sld [smem:[#allocation6]]  ;;  %s785_s13 = sshll.u32 %s942_s23, 3  ;;  %v268_v1 = vlaneseq  ;;  %v900_v2 = vmov 0   ;;  %v256_v5 = vld [vmem:[%s240_s11] sm:$0xff]  ;;  %v901_v14 = vmov 0.0   ;;  %vm280_vm15 = vcmask 31744  }
  0x1f   : > { %828 = vset.pattern.permute.xlu0 %v900_v2  ;;  %s782_s14 = sld [smem:[#allocation6 + $0x1]]  ;;  %829 = vset.pattern.permute.xlu1 %v900_v2  ;;  %v270_v4 = vstv %s785_s13  ;;  %vm277_vm2 = vcmp.ge.f32.partialorder %v256_v5, 0.0  ;;  %v255_v43 = vld [vmem:[%s232_s30] sm:$0xff]  ;;  %vm364_vm0 = vcmask 64512   ;;  %vm389_vm1 = vcmask 261120   ;;  %p793_p5 = scmp.ne.s32.totalorder %s942_s23, 1 }
  0x20   : > { %v969_v3 = vshrl.u32 %v268_v1, 7  ;;  %s786_s15 = sld [smem:[#allocation6 + $0x2]]  ;;  %v253_v44 = vld [vmem:[%s236_s8] sm:$0xff]  ;;  %v294_v47 = vand.u32 127, %v268_v1 }
  0x21   : > { %383 = vmatpush.msra.mxu0 %v253_v44  ;;  %493 = vmatpush.msra.mxu1 %v253_v44  ;;  %v254_v53 = vld [vmem:[%s228_s27] sm:$0xff] }
  0x22   : > { %v271_v6 = vadd.s32 %v270_v4, %v969_v3  ;;  %803 = vmatpush.msra.mxu2 %v253_v44  ;;  %804 = vmatpush.msra.mxu3 %v253_v44  ;;  %vm318_vm12 = vcmp.eq.s32.totalorder %v294_v47, 1  ;;  %vm317_vm13 = vcmp.eq.s32.totalorder %v294_v47, 0  ;;  %v281_v55 = vsel %vm280_vm15, %v254_v53, -inf  ;;  %v331_v4 = vld [vmem:[#allocation2] sm:$0xff] }
  0x24   : > { %v258_v7 = vstv %s257_s12 }
  0x25   : > { %v972_v8 = vcvt.s32.f32 %v258_v7  ;;  %v261_v9 = vstv %s782_s14  ;;  %v430_v7 = vld [vmem:[#allocation3] sm:$0xff] }
  0x26   : > { %v974_v10 = vcvt.s32.f32 %v261_v9  ;;  %v273_v11 = vstv %s786_s15 }
  0x27   : > { %v783_v12 = vadd.f32 -1.0, %v972_v8  ;;  %vm274_vm3 = vcmp.lt.s32.totalorder %v271_v6, %v273_v11 }
  0x28   : > { %v784_v13 = vadd.f32 -1.0, %v974_v10  ;;  %v787_v15 = vsel %vm274_vm3, 1.0, %v901_v14  ;;  %vm315_vm3 = vcmask 0  }
  0x29   : > { %v264_v16 = vmax.f32 %v783_v12, 1.0  ;;  %v978_v17 = vsel %vm277_vm2, %v787_v15, 0.0  ;;  %v431_v12 = vld [vmem:[#allocation3 + $0x8] sm:$0xff]  ;;  %vm306_vm2 = vcmask 7168  }
  0x2a   : > { %v266_v18 = vmax.f32 %v784_v13, 1.0  ;;  %327 = vperm.xlu1 %829, %v978_v17   ;;  %v279_v34 = vsub.f32 %v787_v15, %v978_v17  ;;  %v432_v15 = vld [vmem:[#allocation3 + $0x10] sm:$0xff] }
  0x2b   : > { %830 = vrcp.f32 %v264_v16  ;;  %vm396_vm4 = vweird.f32 %v264_v16  ;;  %v402_v22 = vand.u32 2147483648, %v264_v16  ;;  %v400_v25 = vand.u32 2147483647, %v264_v16 }
  0x2c   : > { %832 = vrcp.f32 %v266_v18  ;;  %v418_v26 = vand.u32 2147483648, %v266_v18  ;;  %vm412_vm6 = vweird.f32 %v266_v18  ;;  %v416_v28 = vand.u32 2147483647, %v266_v18 }
  0x2d   : > { %v403_v30 = vor.u32 1.1754944e-38, %v402_v22  ;;  %vm401_vm9 = vcmp.eq.f32.partialorder %v400_v25, 8.507059e+37 }
  0x2e   : > { %v419_v33 = vor.u32 1.1754944e-38, %v418_v26  ;;  %vm417_vm11 = vcmp.eq.f32.partialorder %v416_v28, 8.507059e+37 }
  0x31   : > { %v831_v19 = vpop.eup %830 }
  0x32   : > { %v833_v20 = vpop.eup %832  ;;  %v392_v21 = vmul.f32 %v831_v19, %v264_v16  ;;  %vm397_vm5 = vweird.f32 %v831_v19 }
  0x33   : > { %v408_v23 = vmul.f32 %v833_v20, %v266_v18  ;;  %vm413_vm7 = vweird.f32 %v833_v20  ;;  %vm398_vm8 = vmor %vm396_vm4, %vm397_vm5 }
  0x34   : > { %v393_v24 = vsub.f32 1.0, %v392_v21  ;;  %vm414_vm10 = vmor %vm412_vm6, %vm413_vm7 }
  0x35   : > { %v409_v27 = vsub.f32 1.0, %v408_v23 }
  0x36   : > { %v394_v29 = vmul.f32 %v831_v19, %v393_v24 }
  0x37   : > { %v410_v31 = vmul.f32 %v833_v20, %v409_v27 }
  0x38   : > { %v395_v32 = vadd.f32 %v831_v19, %v394_v29 }
  0x39   : > { %v411_v35 = vadd.f32 %v833_v20, %v410_v31 }
  0x3a   : > { %v399_v36 = vsel %vm398_vm8, %v831_v19, %v395_v32  ;;  %v433_v19 = vld [vmem:[#allocation3 + $0x18] sm:$0xff] }
  0x3b   : > { %v404_v37 = vsel %vm401_vm9, %v403_v30, %v399_v36  ;;  %v415_v38 = vsel %vm414_vm10, %v833_v20, %v411_v35  ;;  %v304_v35 = vld [vmem:[#allocation4] sm:$0x1] }
  0x3c   : > { %v406_v39 = vmul.f32 %v404_v37, %v978_v17  ;;  %v420_v40 = vsel %vm417_vm11, %v419_v33, %v415_v38 }
  0x3d   : > { %v422_v41 = vmul.f32 %v420_v40, %v279_v34 }
  0x3f   : > { %v423_v42 = vsub.f32 %v406_v39, %v422_v41 }
  0x41   : > { %426 = vperm.xlu0 %828, %v423_v42  }
  0x49   : > { %321 = vperm.xlu0 %828, %v279_v34  }
  0x51   : > { %296 = vperm.xlu0 %828, %v255_v43  }
  0x9c   : > { %v328_v48 = vpop.permute.xlu1 %327 }
  0xb3   : > { %v427_v45 = vpop.permute.xlu0 %426 }
  0xb4   : > { %v429_v46 = vmul.f32 %v427_v45, %v253_v44 }
  0xb6   : > { %434 = vxpose.xlu1.b32.start.end [1/1] (short) (narrow) %v429_v46, 32 }
  0xbb   : > { %v322_v49 = vpop.permute.xlu0 %321 }
  0xbc   : > { %v324_v50 = vsel %vm318_vm12, %v322_v49, 0.0 }
  0xbd   : > { %v330_v51 = vsel %vm317_vm13, %v328_v48, %v324_v50 }
  0xbe   : > { %332 = vxpose.xlu2.b32.start.end [1/1] (short) (narrow) %v330_v51, 8 }
  0xc3   : > { %v297_v52 = vpop.permute.xlu0 %296 }
  0xc4   : > { %vm298_vm14 = vcmp.eq.s32.totalorder %v294_v47, %v297_v52 }
  0xc5   : > { %v299_v54 = vsel %vm298_vm14, %v254_v53, 0.0 }
  0xc6   : > { %v300_v56 = vsel %vm280_vm15, %v299_v54, 0.0 }
 0x12e   : > { %301 = vadd.xlane.f32.xlu1 %v300_v56 }
 0x12f   : > { %282 = vmax.xlane.f32.xlu2 %v281_v55 }
 0x157   : > { %v348_v57 = vpop.trf.xlu2 }
 0x158   : > { %788 = vmatmul.msk.f32.vlgmr.msra.gmra.mxu0 %vm364_vm0, %v348_v57 }
 0x15a   : > { %v450_v58 = vpop.trf.xlu1 }
 0x15b   : > { %789 = vmatmul.msk.f32.vlgmr.msra.gmra.mxu1 %vm364_vm0, %v450_v58 }
 0x162   : > { %v451_v59 = vpop.trf.xlu1 }
 0x163   : > { %790 = vmatmul.msk.f32.vlgmr.msra.gmra.mxu2 %vm364_vm0, %v451_v59 }
 0x16a   : > { %v452_v60 = vpop.trf.xlu1 }
 0x16b   : > { %791 = vmatmul.msk.f32.gmra.mxu2 %vm364_vm0, %v452_v60 }
 0x172   : > { %v453_v61 = vpop.trf.xlu1 }
 0x173   : > { %792 = vmatmul.msk.f32.vlgmr.msra.gmra.mxu3 %vm364_vm0, %v453_v61 }
 0x1a1   : > { %v302_v26 = vpop.xlane.xlu1 %301 }
 0x1a2   : > { %v283_v62 = vpop.xlane.xlu2 %282 }
 0x1a3   : > { %v284_v63 = vsub.f32 %v254_v53, %v283_v62 }
 0x1a5   : > { %v285_v0 = vmul.f32 1.442695, %v284_v63 }
 0x1a7   : > { %834 = vpow2.f32 %v285_v0 }
 0x1ad   : > { %v835_v1 = vpop.eup %834 }
 0x1ae   : > { %v287_v2 = vsel %vm280_vm15, %v835_v1, 0.0 }
 0x1af   : > { %288 = vadd.xlane.f32.xlu0 %v287_v2 }
 0x1d5   : > { %v385_v5 = vpop.f32.mrf.mxu0 }
 0x1d6   : > { %v388_v6 = vadd.f32 %v385_v5, %v331_v4 }
 0x1d8   : > { %390 = vst.msk [vmem:[#allocation2] sm:$0xff] %vm389_vm1, %v388_v6  ;;  %v495_v9 = vpop.f32.mrf.mxu1 }
 0x1d9   : > { %v507_v11 = vadd.f32 %v495_v9, %v430_v7 }
 0x1db   : > { %511 = vst.msk [vmem:[#allocation3] sm:$0xff] %vm389_vm1, %v507_v11 }
 0x1e6   : > { %v498_v13 = vpop.f32.mrf.mxu2 }
 0x1e7   : > { %v508_v14 = vadd.f32 %v498_v13, %v431_v12 }
 0x1e9   : > { %512 = vst.msk [vmem:[#allocation3 + $0x8] sm:$0xff] %vm389_vm1, %v508_v14 }
 0x1ee   : > { %v501_v16 = vpop.f32.mrf.mxu2 }
 0x1ef   : > { %v509_v18 = vadd.f32 %v501_v16, %v432_v15 }
 0x1f1   : > { %513 = vst.msk [vmem:[#allocation3 + $0x10] sm:$0xff] %vm389_vm1, %v509_v18 }
 0x1f6   : > { %v504_v20 = vpop.f32.mrf.mxu3 }
 0x1f7   : > { %v510_v21 = vadd.f32 %v504_v20, %v433_v19 }
 0x1f9   : > { %514 = vst.msk [vmem:[#allocation3 + $0x18] sm:$0xff] %vm389_vm1, %v510_v21 }
 0x222   : > { %v289_v22 = vpop.xlane.xlu0 %288 }
 0x223   : > { %836 = vlog2.f32 %v289_v22 }
 0x229   : > { %v837_v23 = vpop.eup %836 }
 0x22a   : > { %v291_v24 = vmul.f32 0.6931472, %v837_v23 }
 0x22c   : > { %v292_v25 = vadd.f32 %v291_v24, %v283_v62 }
 0x22e   : > { %v303_v27 = vsub.f32 %v292_v25, %v302_v26 }
 0x230   : > { %v305_v28 = vmul.f32 %v303_v27, %v978_v17 }
 0x232   : > { %v307_v29 = vsel %vm306_vm2, %v305_v28, 0.0 }
 0x233   : > { %v308_v30 = vrot.slane %v307_v29, 4 }
 0x235   : > { %v309_v31 = vadd.f32 %v308_v30, %v307_v29 }
 0x237   : > { %v310_v32 = vrot.slane %v309_v31, 2 }
 0x239   : > { %v311_v33 = vadd.f32 %v310_v32, %v309_v31 }
 0x23b   : > { %v312_v34 = vrot.slane %v311_v33, 1 }
 0x23d   : > { %v313_v36 = vadd.f32 %v312_v34, %v311_v33  ;;  %518 = sbr.rel (%p793_p5) target bundleno = 1067 (0x42b), region = 44 }
 0x23f   : > { %v314_v37 = vadd.f32 %v313_v36, %v304_v35 }
 0x241   : > { %316 = vst.msk [vmem:[#allocation4] sm:$0x1] %vm315_vm3, %v314_v37 }
 0x242   : > { %vm519_vm4 = vcmp.eq.s32.totalorder %v969_v3, 0  ;;  %vm520_vm5 = vcmp.eq.s32.totalorder %v969_v3, 1  ;;  %v523_v55 = vld [vmem:[#allocation2] sm:$0xff]  ;;  %v635_v9 = vld [vmem:[#allocation3] sm:$0xff]  ;;  %v636_v15 = vld [vmem:[#allocation3 + $0x8] sm:$0xff]  ;;  %v669_v31 = vmax.f32 %v972_v8, 1.0 }
 0x243   : > { %v521_v17 = vsel %vm520_vm5, %v974_v10, 1.0  ;;  %v637_v21 = vld [vmem:[#allocation3 + $0x10] sm:$0xff]  ;;  %v638_v26 = vld [vmem:[#allocation3 + $0x18] sm:$0xff] }
 0x244   : > { %v522_v38 = vsel %vm519_vm4, %v972_v8, %v521_v17  ;;  %vm675_vm14 = vweird.f32 %v669_v31 }
 0x245   : > { %v524_v39 = vmax.f32 %v522_v38, 1.0  ;;  %v794_v40 = vadd.f32 -1.0, %v522_v38  ;;  %v541_v54 = vsub.f32 0.0, %v522_v38  ;;  %v542_v56 = vsel %vm520_vm5, %v522_v38, 0.0 }
 0x247   : > { %838 = vrcp.f32 %v524_v39  ;;  %v545_v41 = vmax.f32 %v794_v40, 1.0  ;;  %v536_v44 = vand.u32 2147483648, %v524_v39  ;;  %vm530_vm6 = vweird.f32 %v524_v39 }
 0x248   : > { %v534_v47 = vand.u32 2147483647, %v524_v39  ;;  %v543_v63 = vsel %vm519_vm4, %v541_v54, %v542_v56 }
 0x249   : > { %840 = vrcp.f32 %v545_v41  ;;  %v537_v10 = vor.u32 1.1754944e-38, %v536_v44  ;;  %v557_v50 = vand.u32 2147483648, %v545_v41  ;;  %vm551_vm9 = vweird.f32 %v545_v41 }
 0x24a   : > { %v555_v52 = vand.u32 2147483647, %v545_v41  ;;  %vm535_vm11 = vcmp.eq.f32.partialorder %v534_v47, 8.507059e+37  ;;  %842 = vrcp.f32 %v669_v31  ;;  %v679_v44 = vand.u32 2147483647, %v669_v31 }
 0x24b   : > { %v558_v59 = vor.u32 1.1754944e-38, %v557_v50 }
 0x24c   : > { %vm556_vm13 = vcmp.eq.f32.partialorder %v555_v52, 8.507059e+37 }
 0x24d   : > { %v839_v42 = vpop.eup %838 }
 0x24e   : > { %v526_v43 = vmul.f32 %v839_v42, %v524_v39  ;;  %vm531_vm7 = vweird.f32 %v839_v42 }
 0x24f   : > { %v841_v45 = vpop.eup %840  ;;  %vm532_vm8 = vmor %vm530_vm6, %vm531_vm7 }
 0x250   : > { %v527_v46 = vsub.f32 1.0, %v526_v43  ;;  %v547_v48 = vmul.f32 %v841_v45, %v545_v41  ;;  %vm552_vm10 = vweird.f32 %v841_v45  ;;  %v843_v32 = vpop.eup %842 }
 0x251   : > { %vm553_vm12 = vmor %vm551_vm9, %vm552_vm10  ;;  %v671_v34 = vmul.f32 %v843_v32, %v669_v31  ;;  %vm676_vm15 = vweird.f32 %v843_v32 }
 0x252   : > { %v528_v49 = vmul.f32 %v839_v42, %v527_v46  ;;  %v548_v51 = vsub.f32 1.0, %v547_v48 }
 0x253   : > { %v672_v35 = vsub.f32 1.0, %v671_v34 }
 0x254   : > { %v529_v53 = vadd.f32 %v839_v42, %v528_v49  ;;  %v549_v57 = vmul.f32 %v841_v45, %v548_v51 }
 0x255   : > { %v673_v39 = vmul.f32 %v843_v32, %v672_v35 }
 0x256   : > { %v533_v58 = vsel %vm532_vm8, %v839_v42, %v529_v53  ;;  %v550_v61 = vadd.f32 %v841_v45, %v549_v57  ;;  %v681_v42 = vand.u32 2147483648, %v669_v31 }
 0x257   : > { %v538_v60 = vsel %vm535_vm11, %v537_v10, %v533_v58  ;;  %v674_v43 = vadd.f32 %v843_v32, %v673_v39  ;;  %v668_v10 = vld [vmem:[#allocation4] sm:$0x1] }
 0x258   : > { %v540_v62 = vmul.f32 %v538_v60, %v523_v55  ;;  %v554_v0 = vsel %vm553_vm12, %v841_v45, %v550_v61  ;;  %v682_v46 = vor.u32 1.1754944e-38, %v681_v42 }
 0x259   : > { %v559_v1 = vsel %vm556_vm13, %v558_v59, %v554_v0 }
 0x25a   : > { %621 = vmatpush.msra.mxu0 %v540_v62  ;;  %805 = vmatpush.msra.mxu1 %v540_v62  ;;  %v560_v2 = vmul.f32 %v559_v1, %v543_v63 }
 0x25b   : > { %806 = vmatpush.msra.mxu2 %v540_v62  ;;  %807 = vmatpush.msra.mxu3 %v540_v62 }
 0x25c   : > { %v561_v4 = vmul.f32 %v560_v2, %v540_v62 }
 0x25e   : > { %562 = vxpose.xlu0.b32.start.end [1/1] (short) (narrow) %v561_v4, 32 }
 0x302   : > { %v578_v5 = vpop.trf.xlu0 }
 0x303   : > { %795 = vmatmul.msk.f32.vlgmr.msra.gmra.mxu0 %vm364_vm0, %v578_v5 }
 0x30a   : > { %v579_v6 = vpop.trf.xlu0 }
 0x30b   : > { %796 = vmatmul.msk.f32.vlgmr.msra.gmra.mxu1 %vm364_vm0, %v579_v6 }
 0x312   : > { %v580_v7 = vpop.trf.xlu0 }
 0x313   : > { %797 = vmatmul.msk.f32.vlgmr.msra.gmra.mxu2 %vm364_vm0, %v580_v7 }
 0x31a   : > { %v581_v3 = vpop.trf.xlu0 }
 0x31b   : > { %798 = vmatmul.msk.f32.vlgmr.msra.gmra.mxu3 %vm364_vm0, %v581_v3  ;;  %vm677_vm0 = vmor %vm675_vm14, %vm676_vm15 }
 0x31c   : > { %v678_v47 = vsel %vm677_vm0, %v843_v32, %v674_v43 }
 0x380   : > { %v623_v11 = vpop.f32.mrf.mxu0 }
 0x381   : > { %v639_v12 = vadd.f32 %v635_v9, %v623_v11 }
 0x383   : > { %v643_v13 = vmul.f32 %v639_v12, %v639_v12 }
 0x385   : > { %v647_v14 = vsel %vm389_vm1, %v643_v13, 0.0 }
 0x386   : > { %648 = vadd.xlane.f32.xlu0 %v647_v14 }
 0x388   : > { %v626_v16 = vpop.f32.mrf.mxu1 }
 0x389   : > { %v640_v18 = vadd.f32 %v636_v15, %v626_v16 }
 0x38b   : > { %v644_v19 = vmul.f32 %v640_v18, %v640_v18 }
 0x38d   : > { %v650_v20 = vsel %vm389_vm1, %v644_v19, 0.0 }
 0x38e   : > { %651 = vadd.xlane.f32.xlu1 %v650_v20 }
 0x396   : > { %v629_v22 = vpop.f32.mrf.mxu2 }
 0x397   : > { %v641_v23 = vadd.f32 %v637_v21, %v629_v22 }
 0x399   : > { %v645_v24 = vmul.f32 %v641_v23, %v641_v23 }
 0x39b   : > { %v653_v25 = vsel %vm389_vm1, %v645_v24, 0.0 }
 0x39c   : > { %654 = vadd.xlane.f32.xlu1 %v653_v25 }
 0x39e   : > { %v632_v27 = vpop.f32.mrf.mxu3 }
 0x39f   : > { %v642_v28 = vadd.f32 %v638_v26, %v632_v27 }
 0x3a1   : > { %v646_v29 = vmul.f32 %v642_v28, %v642_v28 }
 0x3a3   : > { %v656_v30 = vsel %vm389_vm1, %v646_v29, 0.0  ;;  %vm680_vm1 = vcmp.eq.f32.partialorder %v679_v44, 8.507059e+37 }
 0x3a4   : > { %657 = vadd.xlane.f32.xlu2 %v656_v30  ;;  %v683_v50 = vsel %vm680_vm1, %v682_v46, %v678_v47 }
 0x3a5   : > { %v685_v52 = vmul.f32 %v683_v50, %v668_v10 }
 0x3f9   : > { %v649_v36 = vpop.xlane.xlu0 %648 }
 0x401   : > { %v652_v33 = vpop.xlane.xlu1 %651 }
 0x402   : > { %v659_v17 = vadd.f32 %v652_v33, %v649_v36 }
 0x40f   : > { %v655_v37 = vpop.xlane.xlu1 %654 }
 0x410   : > { %v660_v38 = vadd.f32 %v659_v17, %v655_v37 }
 0x417   : > { %v658_v40 = vpop.xlane.xlu2 %657 }
 0x418   : > { %v661_v41 = vadd.f32 %v660_v38, %v658_v40 }
 0x41a   : > { %v662_v45 = vrot.slane %v661_v41, 4 }
 0x41c   : > { %v663_v8 = vadd.f32 %v662_v45, %v661_v41 }
 0x41e   : > { %v664_v48 = vrot.slane %v663_v8, 2 }
 0x420   : > { %v665_v49 = vadd.f32 %v664_v48, %v663_v8 }
 0x422   : > { %v666_v51 = vrot.slane %v665_v49, 1 }
 0x424   : > { %v667_v53 = vadd.f32 %v666_v51, %v665_v49 }
 0x426   : > { %v686_v54 = vmul.f32 0.00024414063, %v667_v53 }
 0x428   : > { %v687_v55 = vadd.f32 %v686_v54, %v685_v52 }
 0x42a   : > { %688 = vst.msk [vmem:[#allocation7] sm:$0x1] %vm315_vm3, %v687_v55 }
 0x42b PF: > { %p812_p6 = scmp.eq.s32.totalorder %s942_s23, 1  ;;  %s902_s0 = smov [#allocation7]  }
 0x42c   : > { %s695_s24 = sshll.u32 %s902_s0, 4  ;;  %s697_s27 = sshll.u32 %s1049_s5, 4  ;;  %s696_s24 = int_to_ptr.vmem [resolvable:$true] %s695_s24  ;;  %s698_s27 = int_to_ptr.hbm [resolvable:$true] %s697_s27 }
 0x42d   : > { %809 = dma.vmem_to_hbm [thread:$0]  (%p812_p6), %s696_s24, 16, %s698_s27, [#allocation8]  }
 0x42e   : > { %891 = dma.done.wait (%p812_p6), [#allocation8], 16  }
 0x42f   : > { %893 = vsyncadd (%p812_p6), [#allocation8], 4294967280 }
 0x430 PF: > { %s24_s22 = sadd.s32 1, %s896_s22  }
 0x431   : > { %p21_p7 = scmp.ge.s32.totalorder %s24_s22, 4  }
 0x433   :  { %23 = sbr.rel (!%p21_p7) target bundleno = 7 (0x7), region = 80 }
 0x438   :  { %711 = vsyncpa [#allocation8], 1 }
 0x439   :  { %713 = vsyncpa [#allocation8 + $0x1], 1 }

</bundles_post_ra>
